<compile_context>
chip_gen: v7x
topology: tpu7x:2x2x1
jax: 0.10.0
libtpu: 0.0.40
codegen_flags: <defaults>
</compile_context>

<pallas_src>
import functools

import jax
import jax.numpy as jnp
import numpy as np
from jax.experimental import pallas as pl
from jax.experimental.pallas import tpu as pltpu

_LANE = 128
_SUBLANE = 8


def _round_up(x, m):
    return ((x + m - 1) // m) * m


# ---------------------------------------------------------------------------
# Kernels
# ---------------------------------------------------------------------------

def _mlp_kernel_resident(*refs, num_layers: int, compute_dtype):
    """Whole forward per batch tile; W1 is VMEM-resident (single K step)."""
    x_ref = refs[0]
    param_refs = refs[1:1 + 2 * num_layers]
    o_ref = refs[1 + 2 * num_layers]

    h = jnp.dot(x_ref[...], param_refs[0][...],
                preferred_element_type=jnp.float32) + param_refs[1][...]
    if num_layers > 1:
        h = jnp.maximum(h, 0.0)                      # ReLU after layer 0
    for i in range(1, num_layers):
        # nn.Dropout(0.04) before each hidden linear: identity in eval mode.
        h = jnp.dot(h.astype(compute_dtype), param_refs[2 * i][...],
                    preferred_element_type=jnp.float32) + param_refs[2 * i + 1][...]
        if i != num_layers - 1:
            h = jnp.maximum(h, 0.0)                  # ReLU on hidden layers
    o_ref[...] = h.astype(o_ref.dtype)


def _mlp_kernel_ktiled(*refs, num_layers: int, compute_dtype):
    """K-tiled first Linear with f32 VMEM accumulator (huge flattened inputs)."""
    x_ref = refs[0]
    param_refs = refs[1:1 + 2 * num_layers]
    o_ref = refs[1 + 2 * num_layers]
    acc_ref = refs[2 + 2 * num_layers]

    k = pl.program_id(1)

    @pl.when(k == 0)
    def _init():
        acc_ref[...] = jnp.zeros_like(acc_ref)

    acc_ref[...] += jnp.dot(x_ref[...], param_refs[0][...],
                            preferred_element_type=jnp.float32)

    @pl.when(k == pl.num_programs(1) - 1)
    def _finalize():
        h = acc_ref[...] + param_refs[1][...]
        if num_layers > 1:
            h = jnp.maximum(h, 0.0)
        for i in range(1, num_layers):
            h = jnp.dot(h.astype(compute_dtype), param_refs[2 * i][...],
                        preferred_element_type=jnp.float32) + param_refs[2 * i + 1][...]
            if i != num_layers - 1:
                h = jnp.maximum(h, 0.0)
        o_ref[...] = h.astype(o_ref.dtype)


# ---------------------------------------------------------------------------
# Wrapper
# ---------------------------------------------------------------------------

def mlp_forward(x, params, *, compute_dtype=jnp.float32,
                block_batch=None, max_batch_tile=256, min_batch_tiles=2,
                max_block_k=2048, vmem_budget_bytes=24 << 20,
                resident_w1=None):
    """x: (B, input_size); params: list of (W, b), W (in, out), b (out,)."""
    B, K = x.shape
    num_layers = len(params)
    out_size = params[-1][0].shape[1]
    width = params[0][0].shape[1]
    itemsize = jnp.dtype(compute_dtype).itemsize
    out_itemsize = jnp.dtype(x.dtype).itemsize

    # ---- batch tiling: multiples of 8, minimal padding, >=2 tiles for v7x ----
    B8 = _round_up(B, _SUBLANE)
    if block_batch is None:
        if B8 <= _SUBLANE:
            block_batch = B8
        else:
            n_tiles = max(min_batch_tiles, pl.cdiv(B8, max_batch_tile))
            block_batch = min(max_batch_tile,
                              _round_up(pl.cdiv(B8, n_tiles), _SUBLANE))
    block_batch = max(_SUBLANE, _round_up(block_batch, _SUBLANE))
    B_pad = _round_up(max(B, block_batch), block_batch)

    # ---- K / first-layer tiling: pad K only to 128 ----
    K_pad = _round_up(K, _LANE)
    width_pad = _round_up(width, _LANE)

    if resident_w1 is None:
        resident_w1 = (2 * (K_pad * width_pad + block_batch * K_pad) * itemsize
                       <= vmem_budget_bytes)
    if resident_w1:
        block_k = K_pad
        grid = (B_pad // block_batch,)
    else:
        # Largest multiple-of-128 divisor of K_pad that fits the VMEM budget.
        m = K_pad // _LANE
        block_k = _LANE
        for d in range(1, m + 1):
            if m % d:
                continue
            cand = d * _LANE
            if cand > max(_LANE, max_block_k):
                continue
            if 2 * cand * (width_pad + block_batch) * itemsize <= vmem_budget_bytes:
                block_k = max(block_k, cand)
        grid = (B_pad // block_batch, K_pad // block_k)

    # ---- host-side cast + lazy zero-padding (skipped when already aligned) ----
    x_c = x if x.dtype == jnp.dtype(compute_dtype) else x.astype(compute_dtype)
    if (B_pad, K_pad) != (B, K):
        x_c = jnp.pad(x_c, ((0, B_pad - B), (0, K_pad - K)))

    # ---- index maps (arity matches grid rank) ----
    if len(grid) == 1:
        x_map = lambda i: (i, 0)
        inv_map = lambda i: (0, 0)
        w1_map = inv_map
        out_map = lambda i: (i, 0)
    else:
        x_map = lambda i, k: (i, k)
        inv_map = lambda i, k: (0, 0)
        w1_map = lambda i, k: (k, 0)
        out_map = lambda i, k: (i, 0)

    # ---- pad params lane-dense (zero pad rows/cols are inert through ReLU) ----
    flat_params = []
    in_specs = [pl.BlockSpec((block_batch, block_k), x_map)]
    vmem_bytes = 2 * block_batch * block_k * itemsize           # x tile (2 bufs)
    d_in_pad = K_pad
    for li, (w, b) in enumerate(params):
        d_in, d_out = w.shape
        d_out_pad = _round_up(d_out, _LANE)
        w_pad = jnp.pad(w.astype(compute_dtype),
                        ((0, d_in_pad - d_in), (0, d_out_pad - d_out)))
        b_pad = jnp.pad(b.astype(jnp.float32),
                        (0, d_out_pad - d_out)).reshape(1, d_out_pad)
        flat_params += [w_pad, b_pad]
        if li == 0:
            in_specs.append(pl.BlockSpec((block_k, d_out_pad), w1_map))
            vmem_bytes += 2 * block_k * d_out_pad * itemsize
        else:
            in_specs.append(pl.BlockSpec((d_in_pad, d_out_pad), inv_map))
            vmem_bytes += 2 * d_in_pad * d_out_pad * itemsize
        in_specs.append(pl.BlockSpec((1, d_out_pad), inv_map))
        vmem_bytes += 2 * d_out_pad * 4
        d_in_pad = d_out_pad

    out_pad = d_in_pad
    vmem_bytes += 2 * block_batch * out_pad * out_itemsize      # output tile (2 bufs)

    scratch_shapes = []
    if not resident_w1:
        scratch_shapes.append(pltpu.VMEM((block_batch, width_pad), jnp.float32))
        vmem_bytes += block_batch * width_pad * 4

    # Working-set-derived VMEM limit (2x headroom), sized for v7x's 64 MiB VMEM.
    vmem_limit = int(min(max(2 * vmem_bytes, 16 << 20), 64 << 20))

    kernel = functools.partial(
        _mlp_kernel_resident if resident_w1 else _mlp_kernel_ktiled,
        num_layers=num_layers, compute_dtype=compute_dtype)

    dims = ("parallel",) if resident_w1 else ("parallel", "arbitrary")

    out = pl.pallas_call(
        kernel,
        out_shape=jax.ShapeDtypeStruct((B_pad, out_pad), x.dtype),
        grid_spec=pltpu.PrefetchScalarGridSpec(
            num_scalar_prefetch=0,
            grid=grid,
            in_specs=in_specs,
            out_specs=pl.BlockSpec((block_batch, out_pad), out_map),
            scratch_shapes=scratch_shapes,
        ),
        compiler_params=pltpu.CompilerParams(
            dimension_semantics=dims,
            vmem_limit_bytes=vmem_limit,
        ),
    )(x_c, *flat_params)

    return out[:B, :out_size]


# ---------------------------------------------------------------------------
# Init / reference
# ---------------------------------------------------------------------------

def init_params(key, input_size, output_size, num_layers, width, stand_dev=2.0):
    """Matches nn.init.normal_(weight, std=sqrt(stand_dev/width)), bias = 0."""
    std = float(np.sqrt(stand_dev / float(width)))
    dims = [input_size] + [width] * (num_layers - 1) + [output_size]
    params = []
    for i in range(num_layers):
        key, sub = jax.random.split(key)
        w = std * jax.random.normal(sub, (dims[i], dims[i + 1]), dtype=jnp.float32)
        b = jnp.zeros((dims[i + 1],), dtype=jnp.float32)
        params.append((w, b))
    return params


def reference_forward(x, params):
    h = x
    for i, (w, b) in enumerate(params):
        h = h @ w + b
        if i != len(params) - 1:
            h = jnp.maximum(h, 0.0)
    return h


if __name__ == "__main__":
    # Small, module-consistent shapes: flat calorimeter features -> scalar energy.
    batch = 200          # -> 2 batch tiles of 104 rows (both TCs busy on v7x)
    input_size = 300     # stands in for the flattened HCAL+ECAL vector
    output_size = 1      # output_vars = ['energy']
    width = 64
    num_layers = 3       # linear1/relu1, drop2/linear2/relu2, linear3

    key = jax.random.PRNGKey(0)
    key_x, key_p = jax.random.split(key)
    x = jax.random.normal(key_x, (batch, input_size), dtype=jnp.float32)
    params = init_params(key_p, input_size, output_size, num_layers, width,
                         stand_dev=2.0)  # activ='ReLU'

    ref = reference_forward(x, params)

    # Default path: W1 VMEM-resident, single K step, no accumulator.
    out = jax.block_until_ready(mlp_forward(x, params))
    np.testing.assert_allclose(np.asarray(out), np.asarray(ref),
                               rtol=1e-4, atol=1e-4)

    # Forced K-tiled path (3 reduction steps) to exercise the accumulator.
    out_kt = jax.block_until_ready(
        mlp_forward(x, params, resident_w1=False, max_block_k=128))
    np.testing.assert_allclose(np.asarray(out_kt), np.asarray(ref),
                               rtol=1e-4, atol=1e-4)

    # bf16 matmul inputs / f32 accumulation (v6e/v7x MXU-friendly), loose check.
    out_bf16 = jax.block_until_ready(
        mlp_forward(x, params, compute_dtype=jnp.bfloat16))
    np.testing.assert_allclose(np.asarray(out_bf16), np.asarray(ref),
                               rtol=1e-1, atol=1e-1)

    print("KERNEL_OK")
</pallas_src>

<mosaic_0001>
module attributes {stable_mosaic.version = 11 : i64} {
  func.func @_mlp_kernel_resident(%arg0: i32, %arg1: memref<104x384xf32, #tpu.memory_space<vmem>>, %arg2: memref<384x128xf32, #tpu.memory_space<vmem>>, %arg3: memref<1x128xf32, #tpu.memory_space<vmem>>, %arg4: memref<128x128xf32, #tpu.memory_space<vmem>>, %arg5: memref<1x128xf32, #tpu.memory_space<vmem>>, %arg6: memref<128x128xf32, #tpu.memory_space<vmem>>, %arg7: memref<1x128xf32, #tpu.memory_space<vmem>>, %arg8: memref<104x128xf32, #tpu.memory_space<vmem>>) attributes {dimension_semantics = [#tpu.dimension_semantics<parallel>], iteration_bounds = array<i64: 2>, scalar_prefetch = 0 : i64, scratch_operands = 0 : i64, tpu.core_type = #tpu.core_type<tc>, window_params = [{transform_indices = @transform_0, window_bounds = array<i64: 104, 384>}, {pipeline_mode = #tpu.pipeline_mode<synchronous>, transform_indices = @transform_1, window_bounds = array<i64: 384, 128>}, {pipeline_mode = #tpu.pipeline_mode<synchronous>, transform_indices = @transform_2, window_bounds = array<i64: 1, 128>}, {pipeline_mode = #tpu.pipeline_mode<synchronous>, transform_indices = @transform_3, window_bounds = array<i64: 128, 128>}, {pipeline_mode = #tpu.pipeline_mode<synchronous>, transform_indices = @transform_4, window_bounds = array<i64: 1, 128>}, {pipeline_mode = #tpu.pipeline_mode<synchronous>, transform_indices = @transform_5, window_bounds = array<i64: 128, 128>}, {pipeline_mode = #tpu.pipeline_mode<synchronous>, transform_indices = @transform_6, window_bounds = array<i64: 1, 128>}, {transform_indices = @transform_7, window_bounds = array<i64: 104, 128>}]} {
    %c0 = arith.constant 0 : index
    %c0_0 = arith.constant 0 : index
    %0 = vector.load %arg1[%c0, %c0_0] : memref<104x384xf32, #tpu.memory_space<vmem>>, vector<104x384xf32>
    %c0_1 = arith.constant 0 : index
    %c0_2 = arith.constant 0 : index
    %1 = vector.load %arg2[%c0_1, %c0_2] : memref<384x128xf32, #tpu.memory_space<vmem>>, vector<384x128xf32>
    %cst = arith.constant dense<0.000000e+00> : vector<104x128xf32>
    %2 = tpu.matmul %0, %1, %cst {dimension_numbers = #tpu.dot_dimension_numbers<[1], [0], [0], [1], [0, 0, 1, 1], [], []>} : vector<104x384xf32>, vector<384x128xf32>, vector<104x128xf32> -> vector<104x128xf32>
    %c0_3 = arith.constant 0 : index
    %c0_4 = arith.constant 0 : index
    %3 = vector.load %arg3[%c0_3, %c0_4] : memref<1x128xf32, #tpu.memory_space<vmem>>, vector<1x128xf32>
    %4 = vector.broadcast %3 : vector<1x128xf32> to vector<104x128xf32>
    %5 = arith.addf %2, %4 : vector<104x128xf32>
    %cst_5 = arith.constant 0.000000e+00 : f32
    %6 = vector.broadcast %cst_5 : f32 to vector<104x128xf32>
    %7 = arith.maximumf %5, %6 : vector<104x128xf32>
    %c0_6 = arith.constant 0 : index
    %c0_7 = arith.constant 0 : index
    %8 = vector.load %arg4[%c0_6, %c0_7] : memref<128x128xf32, #tpu.memory_space<vmem>>, vector<128x128xf32>
    %cst_8 = arith.constant dense<0.000000e+00> : vector<104x128xf32>
    %9 = tpu.matmul %7, %8, %cst_8 {dimension_numbers = #tpu.dot_dimension_numbers<[1], [0], [0], [1], [0, 0, 1, 1], [], []>} : vector<104x128xf32>, vector<128x128xf32>, vector<104x128xf32> -> vector<104x128xf32>
    %c0_9 = arith.constant 0 : index
    %c0_10 = arith.constant 0 : index
    %10 = vector.load %arg5[%c0_9, %c0_10] : memref<1x128xf32, #tpu.memory_space<vmem>>, vector<1x128xf32>
    %11 = vector.broadcast %10 : vector<1x128xf32> to vector<104x128xf32>
    %12 = arith.addf %9, %11 : vector<104x128xf32>
    %cst_11 = arith.constant 0.000000e+00 : f32
    %13 = vector.broadcast %cst_11 : f32 to vector<104x128xf32>
    %14 = arith.maximumf %12, %13 : vector<104x128xf32>
    %c0_12 = arith.constant 0 : index
    %c0_13 = arith.constant 0 : index
    %15 = vector.load %arg6[%c0_12, %c0_13] : memref<128x128xf32, #tpu.memory_space<vmem>>, vector<128x128xf32>
    %cst_14 = arith.constant dense<0.000000e+00> : vector<104x128xf32>
    %16 = tpu.matmul %14, %15, %cst_14 {dimension_numbers = #tpu.dot_dimension_numbers<[1], [0], [0], [1], [0, 0, 1, 1], [], []>} : vector<104x128xf32>, vector<128x128xf32>, vector<104x128xf32> -> vector<104x128xf32>
    %c0_15 = arith.constant 0 : index
    %c0_16 = arith.constant 0 : index
    %17 = vector.load %arg7[%c0_15, %c0_16] : memref<1x128xf32, #tpu.memory_space<vmem>>, vector<1x128xf32>
    %18 = vector.broadcast %17 : vector<1x128xf32> to vector<104x128xf32>
    %19 = arith.addf %16, %18 : vector<104x128xf32>
    %c0_17 = arith.constant 0 : index
    %c0_18 = arith.constant 0 : index
    %20 = vector.load %arg8[%c0_17, %c0_18] : memref<104x128xf32, #tpu.memory_space<vmem>>, vector<104x128xf32>
    tpu.vector_store %arg8[%c0_17, %c0_18], %19 {strides = array<i32>} : memref<104x128xf32, #tpu.memory_space<vmem>>, vector<104x128xf32>,
    return
  }
  func.func @transform_0(%arg0: i32) -> (i32, i32) {
    %c0_i32 = arith.constant 0 : i32
    %c0_i32_0 = arith.constant 0 : i32
    return %arg0, %c0_i32 : i32, i32
  }
  func.func @transform_1(%arg0: i32) -> (i32, i32) {
    %c0_i32 = arith.constant 0 : i32
    %c0_i32_0 = arith.constant 0 : i32
    %c0_i32_1 = arith.constant 0 : i32
    return %c0_i32, %c0_i32_0 : i32, i32
  }
  func.func @transform_2(%arg0: i32) -> (i32, i32) {
    %c0_i32 = arith.constant 0 : i32
    %c0_i32_0 = arith.constant 0 : i32
    %c0_i32_1 = arith.constant 0 : i32
    return %c0_i32, %c0_i32_0 : i32, i32
  }
  func.func @transform_3(%arg0: i32) -> (i32, i32) {
    %c0_i32 = arith.constant 0 : i32
    %c0_i32_0 = arith.constant 0 : i32
    %c0_i32_1 = arith.constant 0 : i32
    return %c0_i32, %c0_i32_0 : i32, i32
  }
  func.func @transform_4(%arg0: i32) -> (i32, i32) {
    %c0_i32 = arith.constant 0 : i32
    %c0_i32_0 = arith.constant 0 : i32
    %c0_i32_1 = arith.constant 0 : i32
    return %c0_i32, %c0_i32_0 : i32, i32
  }
  func.func @transform_5(%arg0: i32) -> (i32, i32) {
    %c0_i32 = arith.constant 0 : i32
    %c0_i32_0 = arith.constant 0 : i32
    %c0_i32_1 = arith.constant 0 : i32
    return %c0_i32, %c0_i32_0 : i32, i32
  }
  func.func @transform_6(%arg0: i32) -> (i32, i32) {
    %c0_i32 = arith.constant 0 : i32
    %c0_i32_0 = arith.constant 0 : i32
    %c0_i32_1 = arith.constant 0 : i32
    return %c0_i32, %c0_i32_0 : i32, i32
  }
  func.func @transform_7(%arg0: i32) -> (i32, i32) {
    %c0_i32 = arith.constant 0 : i32
    %c0_i32_0 = arith.constant 0 : i32
    return %arg0, %c0_i32 : i32, i32
  }
}

</mosaic_0001>

<bundles_post_ra>
// kernel: tpu_custom_call.1
= control target key start
LH: loop header
LB: loop body
LE: loop exit
PB: predicated region body
PF: predicated region fallthrough
CT: control target
= control target key end

     0   :  { %s2451_s0 = inlined_call_operand.hbm [shape: f32[208,384], index: 0, kind: input, shape index: {}]   ;;  %s2452_s1 = inlined_call_operand.hbm [shape: f32[384,128], index: 1, kind: input, shape index: {}]   ;;  %s2453_s2 = inlined_call_operand.vmem [shape: f32[1,128], index: 2, kind: input, shape index: {}]   ;;  %s2454_s3 = inlined_call_operand.hbm [shape: f32[128,128], index: 3, kind: input, shape index: {}]   ;;  %s2455_s4 = inlined_call_operand.vmem [shape: f32[1,128], index: 4, kind: input, shape index: {}]   ;;  %s2456_s5 = inlined_call_operand.hbm [shape: f32[128,128], index: 5, kind: input, shape index: {}]   ;;  %s2457_s6 = inlined_call_operand.vmem [shape: f32[1,128], index: 6, kind: input, shape index: {}]   ;;  %s2458_s7 = inlined_call_operand.hbm [shape: f32[208,128], index: 7, kind: output, shape index: {}]  }
   0x1   :  { %2462 = sst [smem:[#allocation15_spill]] %s2452_s1 }
   0x2   :  { %12 = vsyncpa [#allocation3], 0 }
   0x3   :  { %14 = vsyncpa [#allocation3 + $0x1], 0 }
   0x4   :  { %15 = vsyncpa [#allocation6], 0 }
   0x5   :  { %16 = vsyncpa [#allocation9], 0 }
   0x6   :  { %17 = vsyncpa [#allocation4], 0 }
   0x7   :  { %19 = vsyncpa [#allocation4 + $0x1], 0  ;;  %s1987_s24 = smov 0   ;;  %s1989_s25 = smov 0  }
   0x8   :  { %s1991_s26 = smov 0   ;;  %s1993_s27 = smov 0  }
   0x9 LB: > { %s2008_s28 = sadd.s32 4294967295, %s1931_s27   ;;  %s1159_s29 = sadd.s32 4294967294, %s1931_s27   ;;  %s1931_s27 = sphi %s1993_s27, %s2483_s27   ;;  %s1927_s26 = sphi %s1991_s26, %s2482_s26   ;;  %s1923_s25 = sphi %s1989_s25, %s2481_s25   ;;  %s1919_s24 = sphi %s1987_s24, %s2480_s24  }
   0xa   : > { %p45_p0 = scmp.ne.s32.totalorder %s1923_s25, %s1919_s24  ;;  %p2459_p1 = scmp.eq.s32.totalorder %s2008_s28, 0 }
   0xb   : > { %p201_p3 = scmp.eq.s32.totalorder %s1159_s29, 1  ;;  %p1160_p5 = scmp.ge.s32.totalorder %s1931_s27, 1 }
   0xc   : > { %p2017_p4 = por %p2459_p1, %p45_p0  ;;  %p208_p7 = scmp.lt.s32.totalorder %s1931_s27, 3 }
   0xd   : > { %p2022_p6 = por %p201_p3, %p45_p0  ;;  %s1933_s10 = smov [#allocation5]  }
   0xe   : > { %s2463_s30 = scalar_select %p2017_p4, 1, 0 }
   0xf   : > { %s2464_s8 = scalar_select %p2022_p6, 1, 0 }
  0x10   : > { %p2027_p8 = pnand %p1160_p5, %p208_p7  ;;  %s220_s11 = sshll.u32 %s1933_s10, 4  ;;  %s2031_s11 = int_to_ptr.vmem [resolvable:$true] %s220_s11 }
  0x11   : > { %s1934_s13 = smov [#allocation7]   ;;  %s2467_s1 = sld [smem:[#allocation15_spill]] }
  0x12   : > { %s2465_s9 = scalar_select %p2027_p8, 1, 0 }
  0x13   : > { %p1672_p9 = pneg %p2027_p8  ;;  %s236_s14 = sshll.u32 %s1934_s13, 4  ;;  %s2042_s14 = int_to_ptr.vmem [resolvable:$true] %s236_s14 }
  0x15   : > { %p2038_p11 = pnand %p1672_p9, %p2459_p1 }
  0x17   : > { %s1743_s17 = scalar_lea.hbm %s2467_s1, 6144  ;;  %p2052_p13 = pneg %p2038_p11 }
  0x18   : > { %p1744_p12 = scmp.ne.s32.totalorder %s2467_s1, %s1743_s17  ;;  %p1750_p5 = scmp.lt.u32.totalorder %s1743_s17, %s2467_s1 }
  0x1a   : > { %p1746_p0 = pnand %p2052_p13, %p1744_p12 }
  0x1c   : > { %p1747_p3 = pneg %p1746_p0 }
  0x1e   : > { %p1752_p7 = pnand %p1750_p5, %p1747_p3 }
  0x20   : > { %1755 = shalt.err (!%p1752_p7)
}
  0x21   : > { %s1756_s23 = scalar_lea.vmem %s2031_s11, 6144  ;;  %p1764_p2 = scmp.lt.s32.totalorder %s2031_s11, %s2031_s11 }
  0x22   : > { %p1757_p9 = scmp.ne.s32.totalorder %s2031_s11, %s1756_s23  ;;  %p1765_p6 = scmp.lt.s32.totalorder %s1756_s23, %s1756_s23 }
  0x24   : > { %p1759_p10 = pnand %p1757_p9, %p2052_p13  ;;  %p1766_p12 = por %p1765_p6, %p1764_p2 }
  0x26   : > { %p1760_p1 = pneg %p1759_p10 }
  0x28   : > { %p1767_p0 = pnand %p1766_p12, %p1760_p1 }
  0x2a   : > { %1770 = shalt.err (!%p1767_p0)
}
  0x2b   : > { %s1935_s29 = smov 128   ;;  %s1936_s10 = smov 8  }
  0x2c   : > { %1675 = dma.hbm_to_vmem [thread:$0]  (!%p2038_p11), %s2467_s1, 6144, %s2031_s11, [#allocation6], %s1935_s29, %s1935_s29, %s1936_s10  }
  0x2d   : > { %s1771_s18 = scalar_lea.hbm %s2454_s3, 2048 }
  0x2e   : > { %p1772_p1 = scmp.ne.s32.totalorder %s2454_s3, %s1771_s18  ;;  %p1778_p10 = scmp.lt.u32.totalorder %s1771_s18, %s2454_s3 }
  0x30   : > { %p1774_p2 = pnand %p1772_p1, %p2052_p13 }
  0x32   : > { %p1775_p6 = pneg %p1774_p2 }
  0x34   : > { %p1780_p3 = pnand %p1778_p10, %p1775_p6 }
  0x36   : > { %1783 = shalt.err (!%p1780_p3)
}
  0x37   : > { %s1784_s11 = scalar_lea.vmem %s2042_s14, 2048  ;;  %p1792_p12 = scmp.lt.s32.totalorder %s2042_s14, %s2042_s14 }
  0x38   : > { %p1785_p5 = scmp.ne.s32.totalorder %s2042_s14, %s1784_s11  ;;  %p1793_p0 = scmp.lt.s32.totalorder %s1784_s11, %s1784_s11 }
  0x3a   : > { %p1787_p7 = pnand %p1785_p5, %p2052_p13  ;;  %p1794_p1 = por %p1793_p0, %p1792_p12 }
  0x3c   : > { %p1788_p9 = pneg %p1787_p7 }
  0x3e   : > { %p1795_p2 = pnand %p1794_p1, %p1788_p9 }
  0x40   : > { %1798 = shalt.err (!%p1795_p2)
}
  0x41   : > { %1678 = dma.hbm_to_vmem [thread:$0]  (!%p2038_p11), %s2454_s3, 2048, %s2042_s14, [#allocation6], %s1935_s29, %s1935_s29, %s1936_s10  }
  0x42   : > { %s1937_s16 = smov [#allocation8]   ;;  %s1799_s21 = scalar_lea.hbm %s2456_s5, 2048 }
  0x43   : > { %s252_s17 = sshll.u32 %s1937_s16, 4  ;;  %p1800_p6 = scmp.ne.s32.totalorder %s2456_s5, %s1799_s21  ;;  %s253_s17 = int_to_ptr.vmem [resolvable:$true] %s252_s17 }
  0x44   : > { %p1806_p5 = scmp.lt.u32.totalorder %s1799_s21, %s2456_s5 }
  0x45   : > { %p1802_p10 = pnand %p1800_p6, %p2052_p13 }
  0x47   : > { %p1803_p3 = pneg %p1802_p10 }
  0x49   : > { %p1808_p7 = pnand %p1806_p5, %p1803_p3 }
  0x4b   : > { %1811 = shalt.err (!%p1808_p7)
}
  0x4c   : > { %s1812_s14 = scalar_lea.vmem %s253_s17, 2048  ;;  %p1820_p1 = scmp.lt.s32.totalorder %s253_s17, %s253_s17 }
  0x4d   : > { %p1813_p9 = scmp.ne.s32.totalorder %s253_s17, %s1812_s14  ;;  %p1821_p2 = scmp.lt.s32.totalorder %s1812_s14, %s1812_s14 }
  0x4f   : > { %p1815_p12 = pnand %p1813_p9, %p2052_p13  ;;  %p1822_p4 = por %p1821_p2, %p1820_p1 }
  0x51   : > { %p1816_p0 = pneg %p1815_p12 }
  0x53   : > { %p1823_p8 = pnand %p1822_p4, %p1816_p0 }
  0x55   : > { %1826 = shalt.err (!%p1823_p8)
}
  0x56   : > { %1681 = dma.hbm_to_vmem [thread:$0]  (!%p2038_p11), %s2456_s5, 2048, %s253_s17, [#allocation9], %s1935_s29, %s1935_s29, %s1936_s10  }
  0x57   : > { %s2124_s20 = sadd.s32 1, %s1931_s27   ;;  %s32_s12 = sadd.s32 1, %s1927_s26 }
  0x58   : > { %s29_s15 = ssub.s32 %s1931_s27, %s2124_s20  ;;  %p39_p4 = scmp.ne.s32.totalorder %s1927_s26, %s1923_s25 }
  0x59   : > { %p30_p8 = scmp.eq.s32.totalorder %s29_s15, 0  ;;  %p40_p13 = scmp.eq.s32.totalorder %s1931_s27, 0 }
  0x5a   : > { %p2469_p6 = scmp.eq.s32.totalorder %s2008_s28, 1  ;;  %p1693_p3 = scmp.lt.s32.totalorder %s1931_s27, 2 }
  0x5b   : > { %s2140_s18 = scalar_select %p30_p8, %s1927_s26, %s32_s12  }
  0x5c   : > { %p2134_p10 = por %p2469_p6, %p39_p4  ;;  %p41_p5 = por %p40_p13, %p39_p4 }
  0x5d   : > { %s269_s19 = sand.u32 1, %s1927_s26   ;;  %s1694_s29 = smul.u32 4992, %s1931_s27 }
  0x5e   : > { %s1652_s21 = smul.u32 312, %s269_s19  ;;  %p2144_p11 = pnand %p1693_p3, %p41_p5 }
  0x5f   : > { %s2151_s23 = scalar_lea.hbm %s2451_s0, %s1694_s29  ;;  %s2155_s1 = scalar_lea.sflag [#allocation3], %s269_s19 }
  0x60   : > { %s273_s11 = scalar_lea.vmem [#allocation2], %s1652_s21  ;;  %s1827_s13 = scalar_lea.hbm %s2151_s23, 4992 }
  0x61   : > { %s281_s14 = sshll.u32 %s273_s11, 4  ;;  %p1828_p7 = scmp.ne.s32.totalorder %s2151_s23, %s1827_s13  ;;  %s2153_s14 = int_to_ptr.vmem [resolvable:$true] %s281_s14 }
  0x62   : > { %p1829_p9 = pneg %p2144_p11  ;;  %s1832_s29 = scalar_lea.hbm %s2451_s0, 9984 }
  0x63   : > { %p1833_p1 = scmp.lt.u32.totalorder %s2151_s23, %s2451_s0  ;;  %p1834_p2 = scmp.lt.u32.totalorder %s1832_s29, %s1827_s13 }
  0x64   : > { %p1830_p12 = pnand %p1829_p9, %p1828_p7  ;;  %p1836_p8 = scmp.lt.u32.totalorder %s1827_s13, %s2151_s23 }
  0x65   : > { %p1835_p4 = por %p1834_p2, %p1833_p1 }
  0x66   : > { %p1831_p0 = pneg %p1830_p12 }
  0x67   : > { %p1837_p13 = por %p1836_p8, %p1835_p4 }
  0x69   : > { %p1838_p6 = pnand %p1837_p13, %p1831_p0 }
  0x6b   : > { %1841 = shalt.err (!%p1838_p6)
}
  0x6c   : > { %s1842_s19 = scalar_lea.vmem %s2153_s14, 4992  ;;  %s1938_s21 = smov [#allocation2]  }
  0x6d   : > { %p1843_p3 = scmp.ne.s32.totalorder %s2153_s14, %s1842_s19  ;;  %s1847_s11 = sshll.u32 %s1938_s21, 4  ;;  %s1848_s11 = int_to_ptr.vmem [resolvable:$false] %s1847_s11 }
  0x6e   : > { %s1849_s12 = scalar_lea.vmem %s1848_s11, 9984  ;;  %p1850_p12 = scmp.lt.s32.totalorder %s2153_s14, %s1848_s11 }
  0x6f   : > { %p1845_p5 = pnand %p1843_p3, %p1829_p9  ;;  %p1851_p1 = scmp.lt.s32.totalorder %s1849_s12, %s1842_s19 }
  0x71   : > { %p1846_p7 = pneg %p1845_p5  ;;  %p1852_p2 = por %p1851_p1, %p1850_p12 }
  0x73   : > { %p1853_p4 = pnand %p1852_p2, %p1846_p7 }
  0x75   : > { %1856 = shalt.err (!%p1853_p4)
}
  0x76   : > { %s1939_s13 = smov 384   ;;  %s1940_s15 = smov 24  }
  0x77   : > { %1685 = dma.hbm_to_vmem [thread:$0]  (!%p2144_p11), %s2151_s23, 4992, %s2153_s14, %s2155_s1, %s1939_s13, %s1939_s13, %s1940_s15  }
  0x78   : > { %p2472_p9 = scmp.ne.s32.totalorder %s2465_s9, 0 }
  0x79   : > { %s2186_s29 = sand.u32 (!%p2472_p9), 1, %s1923_s25   ;;  %p2473_p0 = scmp.ne.s32.totalorder (!%p2472_p9), %s2463_s30, 0 }
  0x7a   : > { %293 = sbr.rel (%p2472_p9) target bundleno = 887 (0x377), region = 48  ;;  %s296_s22 = scalar_lea.sflag (!%p2472_p9), [#allocation3], %s2186_s29 }
  0x7b   : > { %s1654_s17 = smul.u32 (!%p2472_p9), 312, %s2186_s29 }
  0x7d   : > { %s2190_s19 = scalar_lea.vmem (!%p2472_p9), [#allocation2], %s1654_s17 }
  0x81   : > { %1902 = dma.done.wait (%p2473_p0), %s296_s22, 4992  }
  0x82   : > { %1904 = vsyncadd (%p2473_p0), %s296_s22, 4294962304  ;;  %p2474_p11 = scmp.eq.s32.totalorder %s2008_s28, 0 }
  0x84   : > { %1906 = dma.done.wait (%p2474_p11), [#allocation6], 8192   ;;  %p2475_p8 = pmov %p2474_p11 }
  0x86   : > { %1908 = vsyncadd (%p2475_p8), [#allocation6], 4294959104  ;;  %p2476_p13 = pmov %p2475_p8 }
  0x87   : > { %p2477_p6 = pmov %p2475_p8 }
  0x88   : > { %1910 = dma.done.wait (%p2476_p13), [#allocation9], 2048  }
  0x89   : > { %1912 = vsyncadd (%p2477_p6), [#allocation9], 4294965248  ;;  %v1941_v0 = vmov 0.0|0.0   ;;  %vm1942_vm0 = vmmov 0   ;;  %v1943_v1 = vmov 0.0   ;;  %v399_v2 = vld [vmem:[#allocation5 + $0x80] sm:$0xff] }
  0x8a   : > { %1580 = vmatprep.subr.bf16.mxu1 %v1941_v0  ;;  %1367 = vmatprep.mubr.msk.f32.mxu1 %vm1942_vm0, %v1943_v1  ;;  %v400_v3 = vld [vmem:[#allocation5 + $0x88] sm:$0xff]  ;;  %v383_v4 = vld [vmem:[#allocation5] sm:$0xff]  ;;  %v401_v7 = vld [vmem:[#allocation5 + $0x90] sm:$0xff]  ;;  %s1655_s14 = smul.u32 104, %s2186_s29  ;;  %s1944_s30 = smov [#allocation10]  }
  0x8b   : > { %v1548_v5 = vpack.c.bf16 %v400_v3, %v399_v2  ;;  %v384_v6 = vld [vmem:[#allocation5 + $0x8] sm:$0xff]  ;;  %v402_v8 = vld [vmem:[#allocation5 + $0x98] sm:$0xff]  ;;  %v385_v11 = vld [vmem:[#allocation5 + $0x10] sm:$0xff]  ;;  %s1176_s12 = smul.u32 1664, %s2008_s28  ;;  %s1861_s9 = sshll.u32 %s1944_s30, 4  ;;  %s1862_s9 = int_to_ptr.vmem [resolvable:$false] %s1861_s9 }
  0x8c   : > { %v1550_v9 = vpack.c.bf16 %v384_v6, %v383_v4  ;;  %v1552_v10 = vpack.c.bf16 %v402_v8, %v401_v7  ;;  %v386_v12 = vld [vmem:[#allocation5 + $0x18] sm:$0xff]  ;;  %v415_v13 = vld [vmem:[#allocation5 + $0x100] sm:$0xff]  ;;  %v416_v14 = vld [vmem:[#allocation5 + $0x108] sm:$0xff]  ;;  %s2385_s11 = scalar_lea.vmem [#allocation10], %s1655_s14  ;;  %s1863_s10 = scalar_lea.vmem %s1862_s9, 3328 }
  0x8d   : > { %1549 = vmatprep.subr.bf16.mxu0 %v1548_v5  ;;  %v403_v15 = vld [vmem:[#allocation5 + $0xa0] sm:$0xff]  ;;  %v404_v16 = vld [vmem:[#allocation5 + $0xa8] sm:$0xff]  ;;  %v1554_v17 = vpack.c.bf16 %v386_v12, %v385_v11  ;;  %v1581_v18 = vpack.c.bf16 %v416_v14, %v415_v13  ;;  %v417_v19 = vld [vmem:[#allocation5 + $0x110] sm:$0xff]  ;;  %s1057_s13 = sshll.u32 %s2385_s11, 4  ;;  %s2404_s22 = scalar_lea.hbm %s2458_s7, %s1176_s12  ;;  %s2406_s13 = int_to_ptr.vmem [resolvable:$true] %s1057_s13 }
  0x8e   : > { %1551 = vmatpush3.bf16.msra.mxu0 %v1550_v9  ;;  %v1556_v20 = vpack.c.bf16 %v404_v16, %v403_v15  ;;  %v387_v21 = vld [vmem:[#allocation5 + $0x20] sm:$0xff]  ;;  %v388_v22 = vld [vmem:[#allocation5 + $0x28] sm:$0xff]  ;;  %v418_v23 = vld [vmem:[#allocation5 + $0x118] sm:$0xff]  ;;  %s1857_s28 = scalar_lea.vmem %s2406_s13, 1664  ;;  %p1864_p12 = scmp.lt.s32.totalorder %s2406_s13, %s1862_s9 }
  0x8f   : > { %1553 = vmatprep.subr.bf16.mxu0 %v1552_v10  ;;  %1582 = vmatpush3.bf16.msra.mxu1 %v1581_v18  ;;  %v1584_v24 = vpack.c.bf16 %v418_v23, %v417_v19  ;;  %v405_v25 = vld [vmem:[#allocation5 + $0xb0] sm:$0xff]  ;;  %v406_v26 = vld [vmem:[#allocation5 + $0xb8] sm:$0xff]  ;;  %v419_v27 = vld [vmem:[#allocation5 + $0x120] sm:$0xff]  ;;  %v1558_v29 = vpack.c.bf16 %v388_v22, %v387_v21  ;;  %p1858_p3 = scmp.ne.s32.totalorder %s2406_s13, %s1857_s28  ;;  %p1865_p1 = scmp.lt.s32.totalorder %s1863_s10, %s1857_s28 }
  0x90   : > { %1583 = vmatprep.subr.bf16.mxu1 %v1941_v0  ;;  %v420_v28 = vld [vmem:[#allocation5 + $0x128] sm:$0xff]  ;;  %v1560_v30 = vpack.c.bf16 %v406_v26, %v405_v25  ;;  %v389_v31 = vld [vmem:[#allocation5 + $0x30] sm:$0xff]  ;;  %v390_v32 = vld [vmem:[#allocation5 + $0x38] sm:$0xff] }
  0x91   : > { %v1587_v33 = vpack.c.bf16 %v420_v28, %v419_v27  ;;  %v407_v34 = vld [vmem:[#allocation5 + $0xc0] sm:$0xff]  ;;  %v408_v35 = vld [vmem:[#allocation5 + $0xc8] sm:$0xff]  ;;  %v421_v36 = vld [vmem:[#allocation5 + $0x130] sm:$0xff]  ;;  %v1562_v38 = vpack.c.bf16 %v390_v32, %v389_v31  ;;  %p1859_p5 = pnand %p1858_p3, %p2134_p10  ;;  %p1866_p2 = por %p1865_p1, %p1864_p12 }
  0x92   : > { %1555 = vmatpush3.bf16.msra.mxu0 %v1554_v17  ;;  %v422_v37 = vld [vmem:[#allocation5 + $0x138] sm:$0xff]  ;;  %v1564_v39 = vpack.c.bf16 %v408_v35, %v407_v34  ;;  %v391_v40 = vld [vmem:[#allocation5 + $0x40] sm:$0xff]  ;;  %v392_v41 = vld [vmem:[#allocation5 + $0x48] sm:$0xff] }
  0x93   : > { %1557 = vmatprep.subr.bf16.mxu0 %v1556_v20  ;;  %1585 = vmatpush3.bf16.msra.mxu1 %v1584_v24  ;;  %v1590_v42 = vpack.c.bf16 %v422_v37, %v421_v36  ;;  %v409_v43 = vld [vmem:[#allocation5 + $0xd0] sm:$0xff]  ;;  %v410_v44 = vld [vmem:[#allocation5 + $0xd8] sm:$0xff]  ;;  %v423_v45 = vld [vmem:[#allocation5 + $0x140] sm:$0xff]  ;;  %v1566_v48 = vpack.c.bf16 %v392_v41, %v391_v40  ;;  %p1860_p7 = pneg %p1859_p5 }
  0x94   : > { %1586 = vmatprep.subr.bf16.mxu1 %v1941_v0  ;;  %v424_v46 = vld [vmem:[#allocation5 + $0x148] sm:$0xff]  ;;  %v345_v47 = vld [vmem:[%s2190_s19 + $0x8] sm:$0xff]  ;;  %v1568_v49 = vpack.c.bf16 %v410_v44, %v409_v43  ;;  %v411_v53 = vld [vmem:[#allocation5 + $0xe0] sm:$0xff] }
  0x95   : > { %502 = vmatprep.mubr.f32.mxu0 %v345_v47  ;;  %v393_v50 = vld [vmem:[#allocation5 + $0x50] sm:$0xff]  ;;  %v394_v51 = vld [vmem:[#allocation5 + $0x58] sm:$0xff]  ;;  %v1593_v52 = vpack.c.bf16 %v424_v46, %v423_v45  ;;  %v412_v54 = vld [vmem:[#allocation5 + $0xe8] sm:$0xff]  ;;  %p1867_p4 = pnand %p1866_p2, %p1860_p7 }
  0x96   : > { %1559 = vmatpush3.bf16.msra.mxu0 %v1558_v29  ;;  %v425_v55 = vld [vmem:[#allocation5 + $0x150] sm:$0xff]  ;;  %v426_v56 = vld [vmem:[#allocation5 + $0x158] sm:$0xff]  ;;  %v1570_v57 = vpack.c.bf16 %v394_v51, %v393_v50  ;;  %v1572_v58 = vpack.c.bf16 %v412_v54, %v411_v53  ;;  %v395_v59 = vld [vmem:[#allocation5 + $0x60] sm:$0xff] }
  0x97   : > { %1561 = vmatprep.subr.bf16.mxu0 %v1560_v30  ;;  %1588 = vmatpush3.bf16.msra.mxu1 %v1587_v33  ;;  %v396_v60 = vld [vmem:[#allocation5 + $0x68] sm:$0xff]  ;;  %v1596_v61 = vpack.c.bf16 %v426_v56, %v425_v55  ;;  %v413_v62 = vld [vmem:[#allocation5 + $0xf0] sm:$0xff]  ;;  %v414_v63 = vld [vmem:[#allocation5 + $0xf8] sm:$0xff] }
  0x98   : > { %1589 = vmatprep.subr.bf16.mxu1 %v1941_v0  ;;  %v427_v2 = vld [vmem:[#allocation5 + $0x160] sm:$0xff]  ;;  %v428_v3 = vld [vmem:[#allocation5 + $0x168] sm:$0xff]  ;;  %v1574_v4 = vpack.c.bf16 %v396_v60, %v395_v59  ;;  %v1576_v5 = vpack.c.bf16 %v414_v63, %v413_v62  ;;  %v397_v6 = vld [vmem:[#allocation5 + $0x70] sm:$0xff] }
  0x99   : > { %v398_v7 = vld [vmem:[#allocation5 + $0x78] sm:$0xff]  ;;  %v1599_v8 = vpack.c.bf16 %v428_v3, %v427_v2  ;;  %v429_v9 = vld [vmem:[#allocation5 + $0x170] sm:$0xff]  ;;  %v711_v12 = vld [vmem:[#allocation7] sm:$0xff] }
  0x9a   : > { %1563 = vmatpush3.bf16.msra.mxu0 %v1562_v38  ;;  %v430_v10 = vld [vmem:[#allocation5 + $0x178] sm:$0xff]  ;;  %v1578_v11 = vpack.c.bf16 %v398_v7, %v397_v6  ;;  %v712_v13 = vld [vmem:[#allocation7 + $0x8] sm:$0xff]  ;;  %v713_v18 = vld [vmem:[#allocation7 + $0x10] sm:$0xff] }
  0x9b   : > { %1565 = vmatprep.subr.bf16.mxu0 %v1564_v39  ;;  %1591 = vmatpush3.bf16.msra.mxu1 %v1590_v42  ;;  %v1602_v14 = vpack.c.bf16 %v430_v10, %v429_v9  ;;  %v344_v15 = vld [vmem:[%s2190_s19] sm:$0xff]  ;;  %v1605_v16 = vpack.c.bf16 %v712_v13, %v711_v12  ;;  %v714_v19 = vld [vmem:[#allocation7 + $0x18] sm:$0xff]  ;;  %v347_v21 = vld [vmem:[%s2190_s19 + $0x18] sm:$0xff] }
  0x9c   : > { %1592 = vmatprep.subr.bf16.mxu1 %v1941_v0  ;;  %v348_v17 = vld [vmem:[%s2190_s19 + $0x20] sm:$0xff]  ;;  %v346_v20 = vld [vmem:[%s2190_s19 + $0x10] sm:$0xff]  ;;  %v1608_v22 = vpack.c.bf16 %v714_v19, %v713_v18  ;;  %v351_v23 = vld [vmem:[%s2190_s19 + $0x38] sm:$0xff] }
  0x9d   : > { %v715_v24 = vld [vmem:[#allocation7 + $0x20] sm:$0xff]  ;;  %v716_v25 = vld [vmem:[#allocation7 + $0x28] sm:$0xff]  ;;  %v349_v26 = vld [vmem:[%s2190_s19 + $0x28] sm:$0xff] }
  0x9e   : > { %1567 = vmatpush3.bf16.msra.mxu0 %v1566_v48  ;;  %v350_v27 = vld [vmem:[%s2190_s19 + $0x30] sm:$0xff]  ;;  %v1611_v28 = vpack.c.bf16 %v716_v25, %v715_v24  ;;  %v717_v30 = vld [vmem:[#allocation7 + $0x30] sm:$0xff]  ;;  %v720_v37 = vld [vmem:[#allocation7 + $0x48] sm:$0xff] }
  0x9f   : > { %1569 = vmatprep.subr.bf16.mxu0 %v1568_v49  ;;  %1594 = vmatpush3.bf16.msra.mxu1 %v1593_v52  ;;  %v354_v29 = vld [vmem:[%s2190_s19 + $0x50] sm:$0xff]  ;;  %v352_v32 = vld [vmem:[%s2190_s19 + $0x40] sm:$0xff]  ;;  %v353_v33 = vld [vmem:[%s2190_s19 + $0x48] sm:$0xff] }
  0xa0   : > { %1595 = vmatprep.subr.bf16.mxu1 %v1941_v0  ;;  %v718_v31 = vld [vmem:[#allocation7 + $0x38] sm:$0xff]  ;;  %v719_v36 = vld [vmem:[#allocation7 + $0x40] sm:$0xff]  ;;  %v356_v39 = vld [vmem:[%s2190_s19 + $0x60] sm:$0xff] }
  0xa1   : > { %v1614_v34 = vpack.c.bf16 %v718_v31, %v717_v30  ;;  %v357_v35 = vld [vmem:[%s2190_s19 + $0x68] sm:$0xff]  ;;  %v355_v38 = vld [vmem:[%s2190_s19 + $0x58] sm:$0xff]  ;;  %v1617_v40 = vpack.c.bf16 %v720_v37, %v719_v36  ;;  %v360_v41 = vld [vmem:[%s2190_s19 + $0x80] sm:$0xff] }
  0xa2   : > { %1571 = vmatpush3.bf16.msra.mxu0 %v1570_v57  ;;  %v721_v42 = vld [vmem:[#allocation7 + $0x50] sm:$0xff]  ;;  %v722_v43 = vld [vmem:[#allocation7 + $0x58] sm:$0xff]  ;;  %v359_v45 = vld [vmem:[%s2190_s19 + $0x78] sm:$0xff] }
  0xa3   : > { %1573 = vmatprep.subr.bf16.mxu0 %v1572_v58  ;;  %1597 = vmatpush3.bf16.msra.mxu1 %v1596_v61  ;;  %v358_v44 = vld [vmem:[%s2190_s19 + $0x70] sm:$0xff]  ;;  %v1620_v46 = vpack.c.bf16 %v722_v43, %v721_v42  ;;  %v363_v47 = vld [vmem:[%s2190_s19 + $0x98] sm:$0xff]  ;;  %v361_v50 = vld [vmem:[%s2190_s19 + $0x88] sm:$0xff] }
  0xa4   : > { %1598 = vmatprep.subr.bf16.mxu1 %v1941_v0  ;;  %v723_v48 = vld [vmem:[#allocation7 + $0x60] sm:$0xff]  ;;  %v724_v49 = vld [vmem:[#allocation7 + $0x68] sm:$0xff]  ;;  %v365_v55 = vld [vmem:[%s2190_s19 + $0xa8] sm:$0xff] }
  0xa5   : > { %v362_v51 = vld [vmem:[%s2190_s19 + $0x90] sm:$0xff]  ;;  %v1623_v52 = vpack.c.bf16 %v724_v49, %v723_v48  ;;  %v364_v54 = vld [vmem:[%s2190_s19 + $0xa0] sm:$0xff]  ;;  %v369_v56 = vld [vmem:[%s2190_s19 + $0xc8] sm:$0xff] }
  0xa6   : > { %1575 = vmatpush3.bf16.msra.mxu0 %v1574_v4  ;;  %v366_v53 = vld [vmem:[%s2190_s19 + $0xb0] sm:$0xff]  ;;  %v367_v57 = vld [vmem:[%s2190_s19 + $0xb8] sm:$0xff]  ;;  %v368_v58 = vld [vmem:[%s2190_s19 + $0xc0] sm:$0xff] }
  0xa7   : > { %1577 = vmatprep.subr.bf16.mxu0 %v1576_v5  ;;  %1600 = vmatpush3.bf16.msra.mxu1 %v1599_v8  ;;  %v372_v59 = vld [vmem:[%s2190_s19 + $0xe0] sm:$0xff]  ;;  %v370_v60 = vld [vmem:[%s2190_s19 + $0xd0] sm:$0xff]  ;;  %v371_v61 = vld [vmem:[%s2190_s19 + $0xd8] sm:$0xff] }
  0xa8   : > { %1601 = vmatprep.subr.bf16.mxu1 %v1941_v0  ;;  %v375_v62 = vld [vmem:[%s2190_s19 + $0xf8] sm:$0xff]  ;;  %v373_v63 = vld [vmem:[%s2190_s19 + $0xe8] sm:$0xff]  ;;  %v374_v2 = vld [vmem:[%s2190_s19 + $0xf0] sm:$0xff] }
  0xa9   : > { %v378_v3 = vld [vmem:[%s2190_s19 + $0x110] sm:$0xff]  ;;  %v376_v4 = vld [vmem:[%s2190_s19 + $0x100] sm:$0xff]  ;;  %v377_v5 = vld [vmem:[%s2190_s19 + $0x108] sm:$0xff] }
  0xaa   : > { %1579 = vmatpush3.bf16.msra.mxu0 %v1578_v11  ;;  %v381_v6 = vld [vmem:[%s2190_s19 + $0x128] sm:$0xff]  ;;  %v379_v7 = vld [vmem:[%s2190_s19 + $0x118] sm:$0xff]  ;;  %v380_v8 = vld [vmem:[%s2190_s19 + $0x120] sm:$0xff] }
  0xab   : > { %1604 = vmatprep.subr.bf16.mxu0 %v1941_v0  ;;  %1603 = vmatpush3.bf16.msra.mxu1 %v1602_v14  ;;  %v382_v9 = vld [vmem:[%s2190_s19 + $0x130] sm:$0xff]  ;;  %v725_v10 = vld [vmem:[#allocation7 + $0x70] sm:$0xff]  ;;  %v878_v14 = vld [vmem:[#allocation8 + $0x8] sm:$0xff]  ;;  %s1044_s19 = scalar_lea.sflag [#allocation4], %s2186_s29 }
  0xac   : > { %1628 = vmatprep.subr.bf16.mxu1 %v1941_v0  ;;  %v726_v11 = vld [vmem:[#allocation7 + $0x78] sm:$0xff]  ;;  %v877_v13 = vld [vmem:[#allocation8] sm:$0xff] }
  0xad   : > { %503 = vmatmul.mubr.f32.vlgmr.msra.gmra.mrb[0].mxu0 %v344_v15  ;;  %v1626_v12 = vpack.c.bf16 %v726_v11, %v725_v10  ;;  %v879_v15 = vld [vmem:[#allocation8 + $0x10] sm:$0xff]  ;;  %v881_v19 = vld [vmem:[#allocation8 + $0x20] sm:$0xff] }
  0xae   : > { %507 = vmatprep.mubr.f32.mxu0 %v348_v17  ;;  %1606 = vmatpush3.bf16.msra.mxu0 %v1605_v16  ;;  %v1629_v16 = vpack.c.bf16 %v878_v14, %v877_v13  ;;  %v880_v17 = vld [vmem:[#allocation8 + $0x18] sm:$0xff]  ;;  %v885_v25 = vld [vmem:[#allocation8 + $0x40] sm:$0xff] }
  0xaf   : > { %1368 = vmatmul.mubr.f32.vlgmr.msra.gmra.mrb[0].mxu1 %v346_v20  ;;  %1607 = vmatprep.subr.bf16.mxu0 %v1941_v0  ;;  %v1632_v18 = vpack.c.bf16 %v880_v17, %v879_v15  ;;  %v882_v20 = vld [vmem:[#allocation8 + $0x28] sm:$0xff]  ;;  %v889_v31 = vld [vmem:[#allocation8 + $0x60] sm:$0xff] }
  0xb0   : > { %1370 = vmatprep.mubr.msk.f32.mxu1 %vm1942_vm0, %v1943_v1  ;;  %1630 = vmatpush3.bf16.msra.mxu1 %v1629_v16 }
  0xb1   : > { %508 = vmatmul.mubr.f32.gmra.mrb[2].mxu0 %v347_v21  ;;  %1631 = vmatprep.subr.bf16.mxu1 %v1941_v0  ;;  %v1635_v21 = vpack.c.bf16 %v882_v20, %v881_v19 }
  0xb2   : > { %512 = vmatprep.mubr.f32.mxu0 %v351_v23  ;;  %1609 = vmatpush3.bf16.msra.mxu0 %v1608_v22  ;;  %v883_v22 = vld [vmem:[#allocation8 + $0x30] sm:$0xff]  ;;  %v884_v23 = vld [vmem:[#allocation8 + $0x38] sm:$0xff] }
  0xb3   : > { %1371 = vmatmul.mubr.f32.gmra.mrb[2].mxu1 %v349_v26  ;;  %1610 = vmatprep.subr.bf16.mxu0 %v1941_v0  ;;  %v1638_v24 = vpack.c.bf16 %v884_v23, %v883_v22  ;;  %v886_v26 = vld [vmem:[#allocation8 + $0x48] sm:$0xff] }
  0xb4   : > { %1373 = vmatprep.mubr.msk.f32.mxu1 %vm1942_vm0, %v1943_v1  ;;  %1633 = vmatpush3.bf16.msra.mxu1 %v1632_v18 }
  0xb5   : > { %513 = vmatmul.mubr.f32.gmra.mrb[4].mxu0 %v350_v27  ;;  %1634 = vmatprep.subr.bf16.mxu1 %v1941_v0  ;;  %v1641_v27 = vpack.c.bf16 %v886_v26, %v885_v25 }
  0xb6   : > { %517 = vmatprep.mubr.f32.mxu0 %v354_v29  ;;  %1612 = vmatpush3.bf16.msra.mxu0 %v1611_v28  ;;  %v887_v28 = vld [vmem:[#allocation8 + $0x50] sm:$0xff]  ;;  %v888_v29 = vld [vmem:[#allocation8 + $0x58] sm:$0xff] }
  0xb7   : > { %1374 = vmatmul.mubr.f32.gmra.mrb[4].mxu1 %v352_v32  ;;  %1613 = vmatprep.subr.bf16.mxu0 %v1941_v0  ;;  %v1644_v30 = vpack.c.bf16 %v888_v29, %v887_v28  ;;  %v890_v32 = vld [vmem:[#allocation8 + $0x68] sm:$0xff] }
  0xb8   : > { %1376 = vmatprep.mubr.msk.f32.mxu1 %vm1942_vm0, %v1943_v1  ;;  %1636 = vmatpush3.bf16.msra.mxu1 %v1635_v21 }
  0xb9   : > { %518 = vmatmul.mubr.f32.gmra.mrb[6].mxu0 %v353_v33  ;;  %1637 = vmatprep.subr.bf16.mxu1 %v1941_v0  ;;  %v1647_v33 = vpack.c.bf16 %v890_v32, %v889_v31 }
  0xba   : > { %522 = vmatprep.mubr.f32.mxu0 %v357_v35  ;;  %1615 = vmatpush3.bf16.msra.mxu0 %v1614_v34  ;;  %v891_v34 = vld [vmem:[#allocation8 + $0x70] sm:$0xff]  ;;  %v892_v35 = vld [vmem:[#allocation8 + $0x78] sm:$0xff] }
  0xbb   : > { %1377 = vmatmul.mubr.f32.gmra.mrb[6].mxu1 %v355_v38  ;;  %1616 = vmatprep.subr.bf16.mxu0 %v1941_v0  ;;  %v1650_v36 = vpack.c.bf16 %v892_v35, %v891_v34 }
  0xbc   : > { %1379 = vmatprep.mubr.msk.f32.mxu1 %vm1942_vm0, %v1943_v1  ;;  %1639 = vmatpush3.bf16.msra.mxu1 %v1638_v24 }
  0xbd   : > { %523 = vmatmul.mubr.f32.gmra.mrb[8].mxu0 %v356_v39  ;;  %1640 = vmatprep.subr.bf16.mxu1 %v1941_v0  ;;  %v2300_v39 = vld [vmem:[%s2453_s2] ss:$0 sm:$0xff] }
  0xbe   : > { %527 = vmatprep.mubr.f32.mxu0 %v360_v41  ;;  %1618 = vmatpush3.bf16.msra.mxu0 %v1617_v40 }
  0xbf   : > { %1380 = vmatmul.mubr.f32.gmra.mrb[8].mxu1 %v358_v44  ;;  %1619 = vmatprep.subr.bf16.mxu0 %v1941_v0 }
  0xc0   : > { %1382 = vmatprep.mubr.msk.f32.mxu1 %vm1942_vm0, %v1943_v1  ;;  %1642 = vmatpush3.bf16.msra.mxu1 %v1641_v27 }
  0xc1   : > { %528 = vmatmul.mubr.f32.gmra.mrb[10].mxu0 %v359_v45  ;;  %1643 = vmatprep.subr.bf16.mxu1 %v1941_v0 }
  0xc2   : > { %532 = vmatprep.mubr.f32.mxu0 %v363_v47  ;;  %1621 = vmatpush3.bf16.msra.mxu0 %v1620_v46 }
  0xc3   : > { %1383 = vmatmul.mubr.f32.gmra.mrb[10].mxu1 %v361_v50  ;;  %1622 = vmatprep.subr.bf16.mxu0 %v1941_v0 }
  0xc4   : > { %1385 = vmatprep.mubr.msk.f32.mxu1 %vm1942_vm0, %v1943_v1  ;;  %1645 = vmatpush3.bf16.msra.mxu1 %v1644_v30 }
  0xc5   : > { %533 = vmatmul.mubr.f32.gmra.mrb[12].mxu0 %v362_v51  ;;  %1646 = vmatprep.subr.bf16.mxu1 %v1941_v0 }
  0xc6   : > { %537 = vmatprep.mubr.f32.mxu0 %v366_v53  ;;  %1624 = vmatpush3.bf16.msra.mxu0 %v1623_v52 }
  0xc7   : > { %1386 = vmatmul.mubr.f32.gmra.mrb[12].mxu1 %v364_v54  ;;  %1625 = vmatprep.subr.bf16.mxu0 %v1941_v0 }
  0xc8   : > { %1388 = vmatprep.mubr.msk.f32.mxu1 %vm1942_vm0, %v1943_v1  ;;  %1648 = vmatpush3.bf16.msra.mxu1 %v1647_v33 }
  0xc9   : > { %538 = vmatmul.mubr.f32.gmra.mrb[14].mxu0 %v365_v55  ;;  %1649 = vmatprep.subr.bf16.mxu1 %v1941_v0 }
  0xca   : > { %542 = vmatprep.mubr.f32.mxu0 %v369_v56  ;;  %1627 = vmatpush3.bf16.msra.mxu0 %v1626_v12 }
  0xcb   : > { %1389 = vmatmul.mubr.f32.gmra.mrb[14].mxu1 %v367_v57 }
  0xcc   : > { %1391 = vmatprep.mubr.msk.f32.mxu1 %vm1942_vm0, %v1943_v1  ;;  %1651 = vmatpush3.bf16.msra.mxu1 %v1650_v36 }
  0xcd   : > { %543 = vmatmul.mubr.f32.gmra.mrb[16].mxu0 %v368_v58 }
  0xce   : > { %547 = vmatprep.mubr.f32.mxu0 %v372_v59 }
  0xcf   : > { %1392 = vmatmul.mubr.f32.gmra.mrb[16].mxu1 %v370_v60 }
  0xd0   : > { %1394 = vmatprep.mubr.msk.f32.mxu1 %vm1942_vm0, %v1943_v1 }
  0xd1   : > { %548 = vmatmul.mubr.f32.gmra.mrb[18].mxu0 %v371_v61 }
  0xd2   : > { %552 = vmatprep.mubr.f32.mxu0 %v375_v62 }
  0xd3   : > { %1395 = vmatmul.mubr.f32.gmra.mrb[18].mxu1 %v373_v63 }
  0xd4   : > { %1397 = vmatprep.mubr.msk.f32.mxu1 %vm1942_vm0, %v1943_v1 }
  0xd5   : > { %553 = vmatmul.mubr.f32.gmra.mrb[20].mxu0 %v374_v2 }
  0xd6   : > { %557 = vmatprep.mubr.f32.mxu0 %v378_v3 }
  0xd7   : > { %1398 = vmatmul.mubr.f32.gmra.mrb[20].mxu1 %v376_v4 }
  0xd8   : > { %1400 = vmatprep.mubr.msk.f32.mxu1 %vm1942_vm0, %v1943_v1 }
  0xd9   : > { %558 = vmatmul.mubr.f32.gmra.mrb[22].mxu0 %v377_v5 }
  0xda   : > { %562 = vmatprep.mubr.f32.mxu0 %v381_v6 }
  0xdb   : > { %1401 = vmatmul.mubr.f32.gmra.mrb[22].mxu1 %v379_v7 }
  0xdc   : > { %1403 = vmatprep.mubr.msk.f32.mxu1 %vm1942_vm0, %v1943_v1 }
  0xdd   : > { %563 = vmatmul.mubr.f32.gmra.mrb[24].mxu0 %v380_v8 }
  0xde   : > { %1438 = vmatprep.mubr.msk.f32.mxu0 %vm1942_vm0, %v1943_v1 }
  0xdf   : > { %1404 = vmatmul.mubr.f32.gmra.mrb[24].mxu1 %v382_v9 }
  0xe0   : > { %1509 = vmatprep.mubr.msk.f32.mxu1 %vm1942_vm0, %v1943_v1 }
 0x180   : > { %v1209_v37 = vpop.f32.mrb[0].mxu0 }
 0x181   : > { %v1210_v38 = vpop.f32.mrb[1].mxu0 }
 0x182   : > { %v1211_v40 = vadd.f32 %v1210_v38, %v1209_v37  ;;  %v634_v41 = vpop.f32.mrb[0].mxu1 }
 0x183   : > { %v1369_v42 = vpop.f32.mrb[1].mxu1 }
 0x184   : > { %v1212_v43 = vpop.f32.mrb[2].mxu0  ;;  %v505_v44 = vadd.f32 %v1211_v40, %v2300_v39 }
 0x185   : > { %v1213_v45 = vpop.f32.mrb[3].mxu0 }
 0x186   : > { %v635_v46 = vadd.f32 %v634_v41, %v505_v44  ;;  %v1214_v47 = vadd.f32 %v1213_v45, %v1212_v43  ;;  %v639_v48 = vpop.f32.mrb[2].mxu1 }
 0x187   : > { %v1372_v49 = vpop.f32.mrb[3].mxu1 }
 0x188   : > { %v698_v0 = vmax.f32 %v635_v46, 0.0  ;;  %v1215_v50 = vpop.f32.mrb[4].mxu0  ;;  %v510_v51 = vadd.f32 %v1214_v47, %v2300_v39 }
 0x189   : > { %v1216_v52 = vpop.f32.mrb[5].mxu0 }
 0x18a   : > { %v640_v53 = vadd.f32 %v639_v48, %v510_v51  ;;  %v1217_v54 = vadd.f32 %v1216_v52, %v1215_v50  ;;  %1439 = vmatmul.mubr.f32.vlgmr.msra.gmra.mrb[26].mxu0 %v698_v0  ;;  %v644_v55 = vpop.f32.mrb[4].mxu1 }
 0x18b   : > { %v1375_v56 = vpop.f32.mrb[5].mxu1  ;;  %1441 = vmatprep.mubr.msk.f32.mxu0 %vm1942_vm0, %v1943_v1 }
 0x18c   : > { %v699_v57 = vmax.f32 %v640_v53, 0.0  ;;  %v1218_v58 = vpop.f32.mrb[6].mxu0  ;;  %v515_v59 = vadd.f32 %v1217_v54, %v2300_v39 }
 0x18d   : > { %v1219_v60 = vpop.f32.mrb[7].mxu0 }
 0x18e   : > { %v645_v61 = vadd.f32 %v644_v55, %v515_v59  ;;  %v1220_v62 = vadd.f32 %v1219_v60, %v1218_v58  ;;  %1442 = vmatmul.mubr.f32.gmra.mrb[28].mxu0 %v699_v57  ;;  %v649_v63 = vpop.f32.mrb[6].mxu1 }
 0x18f   : > { %v1378_v2 = vpop.f32.mrb[7].mxu1  ;;  %1444 = vmatprep.mubr.msk.f32.mxu0 %vm1942_vm0, %v1943_v1 }
 0x190   : > { %v700_v3 = vmax.f32 %v645_v61, 0.0  ;;  %v1221_v4 = vpop.f32.mrb[8].mxu0  ;;  %v520_v5 = vadd.f32 %v1220_v62, %v2300_v39 }
 0x191   : > { %v1222_v6 = vpop.f32.mrb[9].mxu0 }
 0x192   : > { %v650_v7 = vadd.f32 %v649_v63, %v520_v5  ;;  %v1223_v8 = vadd.f32 %v1222_v6, %v1221_v4  ;;  %1445 = vmatmul.mubr.f32.gmra.mrb[30].mxu0 %v700_v3  ;;  %v654_v9 = vpop.f32.mrb[8].mxu1 }
 0x193   : > { %v1381_v10 = vpop.f32.mrb[9].mxu1  ;;  %1447 = vmatprep.mubr.msk.f32.mxu0 %vm1942_vm0, %v1943_v1 }
 0x194   : > { %v701_v11 = vmax.f32 %v650_v7, 0.0  ;;  %v1224_v12 = vpop.f32.mrb[10].mxu0  ;;  %v525_v13 = vadd.f32 %v1223_v8, %v2300_v39 }
 0x195   : > { %v1225_v14 = vpop.f32.mrb[11].mxu0 }
 0x196   : > { %v655_v15 = vadd.f32 %v654_v9, %v525_v13  ;;  %v1226_v16 = vadd.f32 %v1225_v14, %v1224_v12  ;;  %1448 = vmatmul.mubr.f32.gmra.mrb[32].mxu0 %v701_v11  ;;  %v659_v17 = vpop.f32.mrb[10].mxu1 }
 0x197   : > { %v1384_v18 = vpop.f32.mrb[11].mxu1  ;;  %1450 = vmatprep.mubr.msk.f32.mxu0 %vm1942_vm0, %v1943_v1 }
 0x198   : > { %v702_v19 = vmax.f32 %v655_v15, 0.0  ;;  %v1227_v20 = vpop.f32.mrb[12].mxu0  ;;  %v530_v21 = vadd.f32 %v1226_v16, %v2300_v39 }
 0x199   : > { %v1228_v22 = vpop.f32.mrb[13].mxu0 }
 0x19a   : > { %v660_v23 = vadd.f32 %v659_v17, %v530_v21  ;;  %v1229_v24 = vadd.f32 %v1228_v22, %v1227_v20  ;;  %1451 = vmatmul.mubr.f32.gmra.mrb[34].mxu0 %v702_v19  ;;  %v664_v25 = vpop.f32.mrb[12].mxu1  ;;  %v2342_v17 = vld [vmem:[%s2455_s4] ss:$0 sm:$0xff] }
 0x19b   : > { %v1387_v26 = vpop.f32.mrb[13].mxu1  ;;  %1453 = vmatprep.mubr.msk.f32.mxu0 %vm1942_vm0, %v1943_v1 }
 0x19c   : > { %v703_v27 = vmax.f32 %v660_v23, 0.0  ;;  %v1230_v28 = vpop.f32.mrb[14].mxu0  ;;  %v535_v29 = vadd.f32 %v1229_v24, %v2300_v39 }
 0x19d   : > { %v1231_v30 = vpop.f32.mrb[15].mxu0 }
 0x19e   : > { %v665_v31 = vadd.f32 %v664_v25, %v535_v29  ;;  %v1232_v32 = vadd.f32 %v1231_v30, %v1230_v28  ;;  %1454 = vmatmul.mubr.f32.gmra.mrb[36].mxu0 %v703_v27  ;;  %v669_v33 = vpop.f32.mrb[14].mxu1 }
 0x19f   : > { %v1390_v34 = vpop.f32.mrb[15].mxu1  ;;  %1456 = vmatprep.mubr.msk.f32.mxu0 %vm1942_vm0, %v1943_v1 }
 0x1a0   : > { %v704_v35 = vmax.f32 %v665_v31, 0.0  ;;  %v1233_v36 = vpop.f32.mrb[16].mxu0  ;;  %v540_v37 = vadd.f32 %v1232_v32, %v2300_v39 }
 0x1a1   : > { %v1234_v38 = vpop.f32.mrb[17].mxu0 }
 0x1a2   : > { %v670_v40 = vadd.f32 %v669_v33, %v540_v37  ;;  %v1235_v41 = vadd.f32 %v1234_v38, %v1233_v36  ;;  %1457 = vmatmul.mubr.f32.gmra.mrb[38].mxu0 %v704_v35  ;;  %v674_v42 = vpop.f32.mrb[16].mxu1 }
 0x1a3   : > { %v1393_v43 = vpop.f32.mrb[17].mxu1  ;;  %1459 = vmatprep.mubr.msk.f32.mxu0 %vm1942_vm0, %v1943_v1 }
 0x1a4   : > { %v705_v44 = vmax.f32 %v670_v40, 0.0  ;;  %v1236_v45 = vpop.f32.mrb[18].mxu0  ;;  %v545_v46 = vadd.f32 %v1235_v41, %v2300_v39 }
 0x1a5   : > { %v1237_v47 = vpop.f32.mrb[19].mxu0 }
 0x1a6   : > { %v675_v48 = vadd.f32 %v674_v42, %v545_v46  ;;  %v1238_v49 = vadd.f32 %v1237_v47, %v1236_v45  ;;  %1460 = vmatmul.mubr.f32.gmra.mrb[40].mxu0 %v705_v44  ;;  %v679_v0 = vpop.f32.mrb[18].mxu1 }
 0x1a7   : > { %v1396_v50 = vpop.f32.mrb[19].mxu1  ;;  %1462 = vmatprep.mubr.msk.f32.mxu0 %vm1942_vm0, %v1943_v1 }
 0x1a8   : > { %v706_v51 = vmax.f32 %v675_v48, 0.0  ;;  %v1239_v52 = vpop.f32.mrb[20].mxu0  ;;  %v550_v53 = vadd.f32 %v1238_v49, %v2300_v39 }
 0x1a9   : > { %v1240_v54 = vpop.f32.mrb[21].mxu0 }
 0x1aa   : > { %v680_v55 = vadd.f32 %v679_v0, %v550_v53  ;;  %v1241_v56 = vadd.f32 %v1240_v54, %v1239_v52  ;;  %1463 = vmatmul.mubr.f32.gmra.mrb[42].mxu0 %v706_v51  ;;  %v684_v57 = vpop.f32.mrb[20].mxu1 }
 0x1ab   : > { %v1399_v58 = vpop.f32.mrb[21].mxu1  ;;  %1465 = vmatprep.mubr.msk.f32.mxu0 %vm1942_vm0, %v1943_v1 }
 0x1ac   : > { %v707_v59 = vmax.f32 %v680_v55, 0.0  ;;  %v1242_v60 = vpop.f32.mrb[22].mxu0  ;;  %v555_v61 = vadd.f32 %v1241_v56, %v2300_v39 }
 0x1ad   : > { %v1243_v62 = vpop.f32.mrb[23].mxu0 }
 0x1ae   : > { %v685_v63 = vadd.f32 %v684_v57, %v555_v61  ;;  %v1244_v2 = vadd.f32 %v1243_v62, %v1242_v60  ;;  %1466 = vmatmul.mubr.f32.gmra.mrb[44].mxu0 %v707_v59  ;;  %v689_v3 = vpop.f32.mrb[22].mxu1 }
 0x1af   : > { %v1402_v4 = vpop.f32.mrb[23].mxu1  ;;  %1468 = vmatprep.mubr.msk.f32.mxu0 %vm1942_vm0, %v1943_v1 }
 0x1b0   : > { %v708_v5 = vmax.f32 %v685_v63, 0.0  ;;  %v1245_v6 = vpop.f32.mrb[24].mxu0  ;;  %v560_v7 = vadd.f32 %v1244_v2, %v2300_v39 }
 0x1b1   : > { %v1246_v8 = vpop.f32.mrb[25].mxu0 }
 0x1b2   : > { %v690_v9 = vadd.f32 %v689_v3, %v560_v7  ;;  %v1247_v10 = vadd.f32 %v1246_v8, %v1245_v6  ;;  %1469 = vmatmul.mubr.f32.gmra.mrb[46].mxu0 %v708_v5  ;;  %v694_v11 = vpop.f32.mrb[24].mxu1  ;;  %v1172_v7 = vld [vmem:[%s2457_s6] ss:$0 sm:$0xff] }
 0x1b3   : > { %v1405_v12 = vpop.f32.mrb[25].mxu1  ;;  %1471 = vmatprep.mubr.msk.f32.mxu0 %vm1942_vm0, %v1943_v1 }
 0x1b4   : > { %v709_v13 = vmax.f32 %v690_v9, 0.0  ;;  %v565_v14 = vadd.f32 %v1247_v10, %v2300_v39 }
 0x1b6   : > { %v695_v15 = vadd.f32 %v694_v11, %v565_v14  ;;  %1472 = vmatmul.mubr.f32.gmra.mrb[48].mxu0 %v709_v13 }
 0x1b7   : > { %1474 = vmatprep.mubr.msk.f32.mxu0 %vm1942_vm0, %v1943_v1 }
 0x1b8   : > { %v710_v16 = vmax.f32 %v695_v15, 0.0 }
 0x1ba   : > { %1475 = vmatmul.mubr.f32.gmra.mrb[50].mxu0 %v710_v16 }
 0x25d   : > { %v800_v18 = vpop.f32.mrb[26].mxu0 }
 0x25e   : > { %v801_v19 = vadd.f32 %v2342_v17, %v800_v18  ;;  %v1440_v20 = vpop.f32.mrb[27].mxu0 }
 0x260   : > { %v864_v21 = vmax.f32 %v801_v19, 0.0 }
 0x261   : > { %v805_v22 = vpop.f32.mrb[28].mxu0 }
 0x262   : > { %v806_v39 = vadd.f32 %v2342_v17, %v805_v22  ;;  %v1443_v23 = vpop.f32.mrb[29].mxu0  ;;  %1510 = vmatmul.mubr.f32.vlgmr.msra.gmra.mrb[26].mxu1 %v864_v21 }
 0x263   : > { %1512 = vmatprep.mubr.msk.f32.mxu1 %vm1942_vm0, %v1943_v1 }
 0x264   : > { %v865_v24 = vmax.f32 %v806_v39, 0.0 }
 0x265   : > { %v810_v25 = vpop.f32.mrb[30].mxu0 }
 0x266   : > { %v811_v26 = vadd.f32 %v2342_v17, %v810_v25  ;;  %v1446_v27 = vpop.f32.mrb[31].mxu0  ;;  %1513 = vmatmul.mubr.f32.gmra.mrb[28].mxu1 %v865_v24 }
 0x267   : > { %1515 = vmatprep.mubr.msk.f32.mxu1 %vm1942_vm0, %v1943_v1 }
 0x268   : > { %v866_v28 = vmax.f32 %v811_v26, 0.0 }
 0x269   : > { %v815_v29 = vpop.f32.mrb[32].mxu0 }
 0x26a   : > { %v816_v30 = vadd.f32 %v2342_v17, %v815_v29  ;;  %v1449_v31 = vpop.f32.mrb[33].mxu0  ;;  %1516 = vmatmul.mubr.f32.gmra.mrb[30].mxu1 %v866_v28 }
 0x26b   : > { %1518 = vmatprep.mubr.msk.f32.mxu1 %vm1942_vm0, %v1943_v1 }
 0x26c   : > { %v867_v32 = vmax.f32 %v816_v30, 0.0 }
 0x26d   : > { %v820_v33 = vpop.f32.mrb[34].mxu0 }
 0x26e   : > { %v821_v34 = vadd.f32 %v2342_v17, %v820_v33  ;;  %v1452_v35 = vpop.f32.mrb[35].mxu0  ;;  %1519 = vmatmul.mubr.f32.gmra.mrb[32].mxu1 %v867_v32 }
 0x26f   : > { %1521 = vmatprep.mubr.msk.f32.mxu1 %vm1942_vm0, %v1943_v1 }
 0x270   : > { %v868_v36 = vmax.f32 %v821_v34, 0.0 }
 0x271   : > { %v825_v37 = vpop.f32.mrb[36].mxu0 }
 0x272   : > { %v826_v38 = vadd.f32 %v2342_v17, %v825_v37  ;;  %v1455_v40 = vpop.f32.mrb[37].mxu0  ;;  %1522 = vmatmul.mubr.f32.gmra.mrb[34].mxu1 %v868_v36 }
 0x273   : > { %1524 = vmatprep.mubr.msk.f32.mxu1 %vm1942_vm0, %v1943_v1 }
 0x274   : > { %v869_v41 = vmax.f32 %v826_v38, 0.0 }
 0x275   : > { %v830_v42 = vpop.f32.mrb[38].mxu0 }
 0x276   : > { %v831_v43 = vadd.f32 %v2342_v17, %v830_v42  ;;  %v1458_v44 = vpop.f32.mrb[39].mxu0  ;;  %1525 = vmatmul.mubr.f32.gmra.mrb[36].mxu1 %v869_v41 }
 0x277   : > { %1527 = vmatprep.mubr.msk.f32.mxu1 %vm1942_vm0, %v1943_v1 }
 0x278   : > { %v870_v45 = vmax.f32 %v831_v43, 0.0 }
 0x279   : > { %v835_v46 = vpop.f32.mrb[40].mxu0 }
 0x27a   : > { %v836_v47 = vadd.f32 %v2342_v17, %v835_v46  ;;  %v1461_v48 = vpop.f32.mrb[41].mxu0  ;;  %1528 = vmatmul.mubr.f32.gmra.mrb[38].mxu1 %v870_v45 }
 0x27b   : > { %1530 = vmatprep.mubr.msk.f32.mxu1 %vm1942_vm0, %v1943_v1 }
 0x27c   : > { %v871_v49 = vmax.f32 %v836_v47, 0.0 }
 0x27d   : > { %v840_v0 = vpop.f32.mrb[42].mxu0 }
 0x27e   : > { %v841_v50 = vadd.f32 %v2342_v17, %v840_v0  ;;  %v1464_v51 = vpop.f32.mrb[43].mxu0  ;;  %1531 = vmatmul.mubr.f32.gmra.mrb[40].mxu1 %v871_v49 }
 0x27f   : > { %1533 = vmatprep.mubr.msk.f32.mxu1 %vm1942_vm0, %v1943_v1 }
 0x280   : > { %v872_v52 = vmax.f32 %v841_v50, 0.0 }
 0x281   : > { %v845_v53 = vpop.f32.mrb[44].mxu0 }
 0x282   : > { %v846_v54 = vadd.f32 %v2342_v17, %v845_v53  ;;  %v1467_v55 = vpop.f32.mrb[45].mxu0  ;;  %1534 = vmatmul.mubr.f32.gmra.mrb[42].mxu1 %v872_v52 }
 0x283   : > { %1536 = vmatprep.mubr.msk.f32.mxu1 %vm1942_vm0, %v1943_v1 }
 0x284   : > { %v873_v56 = vmax.f32 %v846_v54, 0.0 }
 0x285   : > { %v850_v57 = vpop.f32.mrb[46].mxu0 }
 0x286   : > { %v851_v58 = vadd.f32 %v2342_v17, %v850_v57  ;;  %v1470_v59 = vpop.f32.mrb[47].mxu0  ;;  %1537 = vmatmul.mubr.f32.gmra.mrb[44].mxu1 %v873_v56 }
 0x287   : > { %1539 = vmatprep.mubr.msk.f32.mxu1 %vm1942_vm0, %v1943_v1 }
 0x288   : > { %v874_v60 = vmax.f32 %v851_v58, 0.0 }
 0x289   : > { %v855_v61 = vpop.f32.mrb[48].mxu0 }
 0x28a   : > { %v856_v62 = vadd.f32 %v2342_v17, %v855_v61  ;;  %v1473_v63 = vpop.f32.mrb[49].mxu0  ;;  %1540 = vmatmul.mubr.f32.gmra.mrb[46].mxu1 %v874_v60 }
 0x28b   : > { %1542 = vmatprep.mubr.msk.f32.mxu1 %vm1942_vm0, %v1943_v1 }
 0x28c   : > { %v875_v2 = vmax.f32 %v856_v62, 0.0 }
 0x28d   : > { %v860_v3 = vpop.f32.mrb[50].mxu0 }
 0x28e   : > { %v861_v4 = vadd.f32 %v2342_v17, %v860_v3  ;;  %v1476_v5 = vpop.f32.mrb[51].mxu0  ;;  %1543 = vmatmul.mubr.f32.gmra.mrb[48].mxu1 %v875_v2 }
 0x28f   : > { %1545 = vmatprep.mubr.msk.f32.mxu1 %vm1942_vm0, %v1943_v1 }
 0x290   : > { %v876_v6 = vmax.f32 %v861_v4, 0.0 }
 0x292   : > { %1546 = vmatmul.mubr.f32.gmra.mrb[50].mxu1 %v876_v6 }
 0x335   : > { %v966_v8 = vpop.f32.mrb[26].mxu1 }
 0x336   : > { %v967_v9 = vadd.f32 %v1172_v7, %v966_v8  ;;  %v1511_v10 = vpop.f32.mrb[27].mxu1 }
 0x338   : > { %1030 = vst [vmem:[%s2385_s11] sm:$0xff] %v967_v9 }
 0x339   : > { %v971_v11 = vpop.f32.mrb[28].mxu1 }
 0x33a   : > { %v972_v1 = vadd.f32 %v1172_v7, %v971_v11  ;;  %v1514_v12 = vpop.f32.mrb[29].mxu1 }
 0x33c   : > { %1031 = vst [vmem:[%s2385_s11 + $0x8] sm:$0xff] %v972_v1 }
 0x33d   : > { %v976_v13 = vpop.f32.mrb[30].mxu1 }
 0x33e   : > { %v977_v14 = vadd.f32 %v1172_v7, %v976_v13  ;;  %v1517_v15 = vpop.f32.mrb[31].mxu1 }
 0x340   : > { %1032 = vst [vmem:[%s2385_s11 + $0x10] sm:$0xff] %v977_v14 }
 0x341   : > { %v981_v16 = vpop.f32.mrb[32].mxu1 }
 0x342   : > { %v982_v17 = vadd.f32 %v1172_v7, %v981_v16  ;;  %v1520_v18 = vpop.f32.mrb[33].mxu1 }
 0x344   : > { %1033 = vst [vmem:[%s2385_s11 + $0x18] sm:$0xff] %v982_v17 }
 0x345   : > { %v986_v19 = vpop.f32.mrb[34].mxu1 }
 0x346   : > { %v987_v20 = vadd.f32 %v1172_v7, %v986_v19  ;;  %v1523_v21 = vpop.f32.mrb[35].mxu1 }
 0x348   : > { %1034 = vst [vmem:[%s2385_s11 + $0x20] sm:$0xff] %v987_v20 }
 0x349   : > { %v991_v22 = vpop.f32.mrb[36].mxu1 }
 0x34a   : > { %v992_v39 = vadd.f32 %v1172_v7, %v991_v22  ;;  %v1526_v23 = vpop.f32.mrb[37].mxu1 }
 0x34c   : > { %1035 = vst [vmem:[%s2385_s11 + $0x28] sm:$0xff] %v992_v39 }
 0x34d   : > { %v996_v24 = vpop.f32.mrb[38].mxu1 }
 0x34e   : > { %v997_v25 = vadd.f32 %v1172_v7, %v996_v24  ;;  %v1529_v26 = vpop.f32.mrb[39].mxu1 }
 0x350   : > { %1036 = vst [vmem:[%s2385_s11 + $0x30] sm:$0xff] %v997_v25 }
 0x351   : > { %v1001_v27 = vpop.f32.mrb[40].mxu1 }
 0x352   : > { %v1002_v28 = vadd.f32 %v1172_v7, %v1001_v27  ;;  %v1532_v29 = vpop.f32.mrb[41].mxu1 }
 0x354   : > { %1037 = vst [vmem:[%s2385_s11 + $0x38] sm:$0xff] %v1002_v28 }
 0x355   : > { %v1006_v30 = vpop.f32.mrb[42].mxu1 }
 0x356   : > { %v1007_v31 = vadd.f32 %v1172_v7, %v1006_v30  ;;  %v1535_v32 = vpop.f32.mrb[43].mxu1 }
 0x358   : > { %1038 = vst [vmem:[%s2385_s11 + $0x40] sm:$0xff] %v1007_v31 }
 0x359   : > { %v1011_v33 = vpop.f32.mrb[44].mxu1 }
 0x35a   : > { %v1012_v34 = vadd.f32 %v1172_v7, %v1011_v33  ;;  %v1538_v35 = vpop.f32.mrb[45].mxu1 }
 0x35c   : > { %1039 = vst [vmem:[%s2385_s11 + $0x48] sm:$0xff] %v1012_v34 }
 0x35d   : > { %v1016_v36 = vpop.f32.mrb[46].mxu1 }
 0x35e   : > { %v1017_v37 = vadd.f32 %v1172_v7, %v1016_v36  ;;  %v1541_v38 = vpop.f32.mrb[47].mxu1 }
 0x360   : > { %1040 = vst [vmem:[%s2385_s11 + $0x50] sm:$0xff] %v1017_v37 }
 0x361   : > { %v1021_v40 = vpop.f32.mrb[48].mxu1 }
 0x362   : > { %v1022_v41 = vadd.f32 %v1172_v7, %v1021_v40  ;;  %v1544_v42 = vpop.f32.mrb[49].mxu1 }
 0x364   : > { %1041 = vst [vmem:[%s2385_s11 + $0x58] sm:$0xff] %v1022_v41 }
 0x365   : > { %v1026_v43 = vpop.f32.mrb[50].mxu1 }
 0x366   : > { %v1027_v44 = vadd.f32 %v1172_v7, %v1026_v43  ;;  %v1547_v45 = vpop.f32.mrb[51].mxu1 }
 0x368   : > { %1042 = vst [vmem:[%s2385_s11 + $0x60] sm:$0xff] %v1027_v44 }
 0x369   : > { %1870 = shalt.err (!%p1867_p4)
}
 0x36a   : > { %s1871_s23 = scalar_lea.hbm %s2404_s22, 1664  ;;  %s1875_s21 = scalar_lea.hbm %s2458_s7, 3328 }
 0x36b   : > { %p1872_p9 = scmp.ne.s32.totalorder %s2404_s22, %s1871_s23  ;;  %p1876_p8 = scmp.lt.u32.totalorder %s2404_s22, %s2458_s7 }
 0x36c   : > { %p1877_p13 = scmp.lt.u32.totalorder %s1875_s21, %s1871_s23  ;;  %p1879_p3 = scmp.lt.u32.totalorder %s1871_s23, %s2404_s22 }
 0x36d   : > { %p1873_p0 = pnand %p1872_p9, %p2134_p10 }
 0x36e   : > { %p1878_p6 = por %p1877_p13, %p1876_p8 }
 0x36f   : > { %p1874_p11 = pneg %p1873_p0 }
 0x370   : > { %p1880_p5 = por %p1879_p3, %p1878_p6 }
 0x372   : > { %p1881_p7 = pnand %p1880_p5, %p1874_p11 }
 0x374   : > { %1884 = shalt.err (!%p1881_p7)
}
 0x375   : > { %s1945_s15 = smov 128   ;;  %s1946_s17 = smov 8  }
 0x376   : > { %1670 = dma.vmem_to_hbm [thread:$0]  (%p2134_p10), %s2406_s13, 1664, %s2404_s22, %s1044_s19, %s1945_s15, %s1945_s15, %s1946_s17  }
 0x377 PF: > { %s1072_s28 = sand.u32 1, %s1919_s24   ;;  %p2478_p12 = scmp.ne.s32.totalorder %s2464_s8, 0 }
 0x378   : > { %p2479_p1 = scmp.ge.s32.totalorder %s1931_s27, 2  ;;  %s1073_s30 = scalar_lea.sflag [#allocation4], %s1072_s28 }
 0x37a   : > { %p1687_p2 = pnand %p2479_p1, %p2478_p12 }
 0x37c   : > { %1914 = dma.done.wait (!%p1687_p2), %s1073_s30, 1664  }
 0x37d   : > { %1916 = vsyncadd (!%p1687_p2), %s1073_s30, 4294965632  ;;  %p22_p4 = scmp.ge.s32.totalorder %s2124_s20, 4   ;;  %s2480_s24 = smov %s1923_s25 }
 0x37e   : > { %s2481_s25 = smov %s1927_s26  ;;  %s2482_s26 = smov %s2140_s18 }
 0x37f   : > { %s2483_s27 = smov %s2124_s20  ;;  %24 = sbr.rel (!%p22_p4) target bundleno = 9 (0x9), region = 105 }
 0x386   :  { %1078 = vsyncpa [#allocation3], 1 }
 0x387   :  { %1080 = vsyncpa [#allocation3 + $0x1], 1 }
 0x388   :  { %1081 = vsyncpa [#allocation6], 1 }
 0x389   :  { %1082 = vsyncpa [#allocation9], 1 }
 0x38a   :  { %1083 = vsyncpa [#allocation4], 1 }
 0x38b   :  { %1085 = vsyncpa [#allocation4 + $0x1], 1 }

</bundles_post_ra>
